<compile_context>
chip_gen: v6e
topology: v6e:2x2x1
jax: 0.10.0
libtpu: 0.0.40
codegen_flags: <defaults>
</compile_context>

<pallas_src>
import math

import jax
import jax.numpy as jnp
from jax import lax
from jax.experimental import pallas as pl
from jax.experimental.pallas import tpu as pltpu

_BN_EPS = 1e-5
_VMEM_LIMIT = 64 * 1024 * 1024          # scoped-VMEM limit for the compiler
_PASS1_VMEM_BUDGET = 40 * 1024 * 1024   # working-set target (v7x headroom)
_MAX_M_TILE = 1024                      # lane-axis tile upper bound
_COUT_SPLIT = 256                       # Cout block for the 'parallel' axis


# --------------------------------------------------------------------------- #
# helpers
# --------------------------------------------------------------------------- #
def _round_up(x, m):
    return ((x + m - 1) // m) * m


def _choose_m_tile(m_real, min_tile, vmem_per_tm):
    """Pick tm (multiple of 128): minimize padded M, then maximize tm, while the
    estimated pass-1 VMEM working set stays under budget."""
    m128 = _round_up(m_real, 128)
    lo = _round_up(max(min_tile, 128), 128)
    hi = max(lo, min(_MAX_M_TILE, m128))
    best = None
    for tm in range(lo, hi + 1, 128):
        if tm != lo and vmem_per_tm(tm) > _PASS1_VMEM_BUDGET:
            continue
        m_pad = _round_up(m128, tm)
        key = (m_pad, -tm)
        if best is None or key < best[0]:
            best = (key, tm, m_pad)
    _, tm, m_pad = best
    return tm, m_pad, m_pad // tm


def _choose_cout_split(cout):
    if cout > _COUT_SPLIT and cout % _COUT_SPLIT == 0:
        return _COUT_SPLIT, cout // _COUT_SPLIT
    return cout, 1


def _prep_w(w):
    """PyTorch OIHW -> (taps, Cout, Cin) bf16, taps in (kh, kw) row-major order."""
    cout, cin, kh, kw = w.shape
    return (jnp.transpose(w, (2, 3, 0, 1))
            .reshape(kh * kw, cout, cin).astype(jnp.bfloat16))


# --------------------------------------------------------------------------- #
# Pallas kernels
# --------------------------------------------------------------------------- #
def _make_pass1_kernel(*, taps, n_phase, phase_has_b, use_mask, tm, inv_m_valid):
    """Pass 1 (grid=(n_cout_blocks, n_m_tiles), ('parallel','arbitrary')):
    implicit-GEMM matmul (taps built from rolled phase windows) + shifted
    per-channel sum / sum-of-squares, finalized to mean/var on the last tile.
    Y is written in bf16; stats accumulate per-lane in f32 VMEM scratch."""
    b_index, nb = {}, 0
    for p in range(n_phase):
        if phase_has_b[p]:
            b_index[p] = nb
            nb += 1
    n_b = nb

    def kernel(*refs):
        pos = 0
        a_refs = refs[pos:pos + n_phase]; pos += n_phase
        b_refs = refs[pos:pos + n_b]; pos += n_b
        w_ref = refs[pos]; pos += 1
        mask_ref = None
        if use_mask:
            mask_ref = refs[pos]; pos += 1
        y_ref, mean_ref, var_ref, s_sc, q_sc, sh_sc = refs[pos:pos + 6]

        m_idx = pl.program_id(1)
        cblk = y_ref.shape[0]

        a_vals = [a_refs[p][...] for p in range(n_phase)]
        b_vals = [b_refs[b_index[p]][...] if phase_has_b[p] else None
                  for p in range(n_phase)]
        lane = None

        # ---- implicit GEMM: one MXU matmul per tap, tap = rolled window ----
        acc = jnp.zeros((cblk, tm), jnp.float32)
        for t, (p, off) in enumerate(taps):
            if off == 0:
                tap = a_vals[p]
            else:
                if lane is None:
                    lane = lax.broadcasted_iota(jnp.int32, a_vals[p].shape, 1)
                ra = pltpu.roll(a_vals[p], tm - off, axis=1)
                rb = pltpu.roll(b_vals[p], tm - off, axis=1)
                tap = jnp.where(lane < (tm - off), ra, rb)
            acc += jnp.dot(w_ref[t], tap, preferred_element_type=jnp.float32)
        y = acc
        y_ref[...] = y.astype(y_ref.dtype)

        # ---- shifted (anchored) statistics, per-lane partial accumulation ----
        @pl.when(m_idx == 0)
        def _():
            sh_sc[...] = jnp.sum(y, axis=1, keepdims=True) * (1.0 / tm)
            s_sc[...] = jnp.zeros_like(s_sc)
            q_sc[...] = jnp.zeros_like(q_sc)

        yc = y - sh_sc[...]
        if use_mask:
            t1 = yc * mask_ref[...]          # mask out halo / pad columns
        else:
            t1 = yc
        t2 = t1 * yc
        for c0 in range(0, tm, 128):          # VPU adds; no per-tile XLU reduce
            s_sc[...] += t1[:, c0:c0 + 128]
            q_sc[...] += t2[:, c0:c0 + 128]

        @pl.when(m_idx == pl.num_programs(1) - 1)
        def _():
            s = jnp.sum(s_sc[...], axis=1, keepdims=True) * inv_m_valid
            q = jnp.sum(q_sc[...], axis=1, keepdims=True) * inv_m_valid
            mean_ref[...] = sh_sc[...] + s
            var_ref[...] = q - s * s

    return kernel


def _make_pass2_kernel(relu, has_res):
    """Pass 2 (grid=(n_m_tiles,), 'parallel'): normalize + affine [+res] [+ReLU]."""
    def kernel(y_ref, mean_ref, var_ref, g_ref, b_ref, *rest):
        if has_res:
            r_ref, o_ref = rest
        else:
            (o_ref,) = rest
        scale = lax.rsqrt(var_ref[...] + _BN_EPS) * g_ref[...]
        out = (y_ref[...].astype(jnp.float32) - mean_ref[...]) * scale + b_ref[...]
        if has_res:
            out = out + r_ref[...].astype(jnp.float32)
        if relu:
            out = jnp.maximum(out, 0.0)
        o_ref[...] = out.astype(o_ref.dtype)
    return kernel


def _make_fused_kernel(m_real, m_pad, relu, has_res):
    """Single-block fully fused 1x1 conv + BN [+res] [+ReLU] (whole M in VMEM)."""
    inv_m = 1.0 / float(m_real)
    npad = m_pad - m_real

    def kernel(p_ref, w_ref, g_ref, b_ref, *rest):
        if has_res:
            r_ref, o_ref = rest
        else:
            (o_ref,) = rest
        y = jnp.dot(w_ref[0], p_ref[...], preferred_element_type=jnp.float32)
        # keep Y at bf16 precision so all conv paths have identical numerics
        y = y.astype(jnp.bfloat16).astype(jnp.float32)
        mean = jnp.sum(y, axis=1, keepdims=True) * inv_m   # pad columns are 0
        yc = y - mean
        ss = jnp.sum(yc * yc, axis=1, keepdims=True)
        if npad:
            ss = ss - float(npad) * (mean * mean)           # remove pad columns
        var = ss * inv_m
        out = yc * (lax.rsqrt(var + _BN_EPS) * g_ref[...]) + b_ref[...]
        if has_res:
            out = out + r_ref[...].astype(jnp.float32)
        if relu:
            out = jnp.maximum(out, 0.0)
        o_ref[...] = out.astype(o_ref.dtype)
    return kernel


# --------------------------------------------------------------------------- #
# generic two-pass conv(bias=False) + BN (training batch stats) driver
# --------------------------------------------------------------------------- #
def _conv_bn_general(phase_flats, taps, phase_has_b, w_taps, mask, m_valid,
                     gamma, beta, *, relu, residual, out_dtype, tm, n_tiles):
    n_phase = len(phase_flats)
    n_taps, cout, cin = w_taps.shape
    out_cols = n_tiles * tm
    cblk, n_c = _choose_cout_split(cout)
    use_mask = mask is not None

    # ---------------- pass 1: matmul + BN statistics ------------------------
    in_specs, args = [], []
    for p in range(n_phase):
        in_specs.append(pl.BlockSpec((cin, tm), lambda c, m: (0, m)))
        args.append(phase_flats[p])
    for p in range(n_phase):
        if phase_has_b[p]:
            in_specs.append(pl.BlockSpec((cin, tm), lambda c, m: (0, m + 1)))
            args.append(phase_flats[p])
    in_specs.append(pl.BlockSpec((n_taps, cblk, cin), lambda c, m: (0, c, 0)))
    args.append(w_taps)
    if use_mask:
        in_specs.append(pl.BlockSpec((1, tm), lambda c, m: (0, m)))
        args.append(mask)

    kernel1 = _make_pass1_kernel(taps=tuple(taps), n_phase=n_phase,
                                 phase_has_b=tuple(phase_has_b),
                                 use_mask=use_mask, tm=tm,
                                 inv_m_valid=1.0 / float(m_valid))
    y, mean, var = pl.pallas_call(
        kernel1,
        out_shape=(jax.ShapeDtypeStruct((cout, out_cols), jnp.bfloat16),
                   jax.ShapeDtypeStruct((cout, 1), jnp.float32),
                   jax.ShapeDtypeStruct((cout, 1), jnp.float32)),
        grid=(n_c, n_tiles),
        in_specs=in_specs,
        out_specs=(pl.BlockSpec((cblk, tm), lambda c, m: (c, m)),
                   pl.BlockSpec((cblk, 1), lambda c, m: (c, 0)),
                   pl.BlockSpec((cblk, 1), lambda c, m: (c, 0))),
        scratch_shapes=[pltpu.VMEM((cblk, 128), jnp.float32),
                        pltpu.VMEM((cblk, 128), jnp.float32),
                        pltpu.VMEM((cblk, 1), jnp.float32)],
        compiler_params=pltpu.CompilerParams(
            dimension_semantics=("parallel", "arbitrary"),
            vmem_limit_bytes=_VMEM_LIMIT),
        cost_estimate=pl.CostEstimate(
            flops=int(2 * cout * n_taps * cin * out_cols), transcendentals=0,
            bytes_accessed=int(sum(a.nbytes for a in args) + cout * out_cols * 2)),
    )(*args)

    # ---------------- pass 2: normalize + affine (+res) (+ReLU) -------------
    has_res = residual is not None
    args2 = [y, mean, var, gamma, beta] + ([residual] if has_res else [])
    in_specs2 = [pl.BlockSpec((cout, tm), lambda m: (0, m)),
                 pl.BlockSpec((cout, 1), lambda m: (0, 0)),
                 pl.BlockSpec((cout, 1), lambda m: (0, 0)),
                 pl.BlockSpec((cout, 1), lambda m: (0, 0)),
                 pl.BlockSpec((cout, 1), lambda m: (0, 0))]
    if has_res:
        in_specs2.append(pl.BlockSpec((cout, tm), lambda m: (0, m)))
    out = pl.pallas_call(
        _make_pass2_kernel(relu, has_res),
        out_shape=jax.ShapeDtypeStruct((cout, out_cols), out_dtype),
        grid=(n_tiles,),
        in_specs=in_specs2,
        out_specs=pl.BlockSpec((cout, tm), lambda m: (0, m)),
        compiler_params=pltpu.CompilerParams(
            dimension_semantics=("parallel",),
            vmem_limit_bytes=_VMEM_LIMIT),
        cost_estimate=pl.CostEstimate(
            flops=int(8 * cout * out_cols), transcendentals=int(cout),
            bytes_accessed=int(sum(a.nbytes for a in args2)
                               + cout * out_cols * jnp.dtype(out_dtype).itemsize)),
    )(*args2)
    return out


# --------------------------------------------------------------------------- #
# conv1x1 + BN [+res] [+ReLU]
# --------------------------------------------------------------------------- #
def _conv1x1_bn(x_cm, w_taps, gamma, beta, *, stride=1, relu=True,
                residual=None, out_dtype=jnp.bfloat16):
    n_taps, cout, cin = w_taps.shape
    assert n_taps == 1
    c, n, h, wd = x_cm.shape
    assert c == cin
    ho, wo = (h - 1) // stride + 1, (wd - 1) // stride + 1
    xs = x_cm[:, :, ::stride, ::stride] if stride > 1 else x_cm
    m_real = n * ho * wo
    pmat = xs.reshape(cin, m_real).astype(jnp.bfloat16)

    def p1_bytes(tm):
        return 2 * (2 * cin * tm * 2 + cout * cin * 2 + cout * tm * 2) \
            + 8 * cout * 128

    tm, m_pad, n_tiles = _choose_m_tile(m_real, 128, p1_bytes)
    g = gamma.reshape(cout, 1).astype(jnp.float32)
    b = beta.reshape(cout, 1).astype(jnp.float32)

    res = None
    if residual is not None:
        res = residual.astype(jnp.bfloat16).reshape(cout, m_real)
        res = jnp.pad(res, ((0, 0), (0, m_pad - m_real)))

    if n_tiles == 1:
        pmat = jnp.pad(pmat, ((0, 0), (0, m_pad - m_real)))
        args = [pmat, w_taps, g, b] + ([res] if res is not None else [])
        vspec = pl.BlockSpec(memory_space=pltpu.MemorySpace.VMEM)
        out = pl.pallas_call(
            _make_fused_kernel(m_real, m_pad, relu, res is not None),
            out_shape=jax.ShapeDtypeStruct((cout, m_pad), out_dtype),
            in_specs=[vspec] * len(args),
            out_specs=vspec,
            compiler_params=pltpu.CompilerParams(vmem_limit_bytes=_VMEM_LIMIT),
            cost_estimate=pl.CostEstimate(
                flops=int(2 * cout * cin * m_pad + 8 * cout * m_pad),
                transcendentals=int(cout),
                bytes_accessed=int(sum(a.nbytes for a in args)
                                   + cout * m_pad * jnp.dtype(out_dtype).itemsize)),
        )(*args)
    else:
        pmat = jnp.pad(pmat, ((0, 0), (0, n_tiles * tm - m_real)))
        mask = None
        if m_pad != m_real:   # pad columns must stay out of the shifted stats
            mask = (jnp.arange(n_tiles * tm, dtype=jnp.int32) < m_real)
            mask = mask.astype(jnp.float32).reshape(1, -1)
        out = _conv_bn_general([pmat], [(0, 0)], [False], w_taps, mask, m_real,
                               g, b, relu=relu, residual=res,
                               out_dtype=out_dtype, tm=tm, n_tiles=n_tiles)
    return out[:, :m_real].reshape(cout, n, ho, wo)


# --------------------------------------------------------------------------- #
# conv3x3 (pad=1, groups=1, dilation=1, stride 1 or 2) + BN + ReLU
# --------------------------------------------------------------------------- #
def _conv3x3_bn(x_cm, w_taps, gamma, beta, *, stride=1, relu=True,
                out_dtype=jnp.bfloat16):
    n_taps, cout, cin = w_taps.shape
    assert n_taps == 9
    c, n, h, wd = x_cm.shape
    assert c == cin
    s = stride
    ho = (h + 2 - 3) // s + 1
    wo = (wd + 2 - 3) // s + 1
    xp = jnp.pad(x_cm, ((0, 0), (0, 0), (1, 1), (1, 1))).astype(jnp.bfloat16)

    if s == 1:
        hs, ws = h + 2, wd + 2
        phase_list = [xp]
        taps = [(0, i * ws + j) for i in range(3) for j in range(3)]
    else:  # stride 2: parity decomposition makes every tap a stride-1 shift
        hs, ws = -(-(h + 2) // 2), -(-(wd + 2) // 2)
        phase_list = []
        for pi in range(2):
            for pj in range(2):
                ph = xp[:, :, pi::2, pj::2]
                ph = jnp.pad(ph, ((0, 0), (0, 0),
                                  (0, hs - ph.shape[2]), (0, ws - ph.shape[3])))
                phase_list.append(ph)
        taps = [((i % 2) * 2 + (j % 2), (i // 2) * ws + (j // 2))
                for i in range(3) for j in range(3)]

    m_grid = n * hs * ws          # implicit-GEMM grid (includes halo columns)
    m_valid = n * ho * wo         # real output columns (BN statistics divisor)
    off_max = max(off for _, off in taps)
    n_phase = len(phase_list)
    phase_has_b = [any(off > 0 for p, off in taps if p == pp)
                   for pp in range(n_phase)]
    n_b = sum(phase_has_b)

    def p1_bytes(tm):
        return (2 * (2 * (n_phase + n_b) * cin * tm * 2 + 9 * cout * cin * 2
                     + cout * tm * 2 + tm * 4) + 8 * cout * 128)

    tm, m_pad, n_tiles = _choose_m_tile(m_grid, _round_up(off_max, 128), p1_bytes)
    pcols = (n_tiles + 1) * tm    # extra block so the "next block" window exists
    phase_flats = [jnp.pad(ph.reshape(cin, m_grid), ((0, 0), (0, pcols - m_grid)))
                   for ph in phase_list]

    # validity mask: 1 on real output columns, 0 on halo / pad columns
    col = jnp.arange(n_tiles * tm, dtype=jnp.int32)
    sp = col % (hs * ws)
    mask = ((col < m_grid) & (sp // ws < ho) & (sp % ws < wo))
    mask = mask.astype(jnp.float32).reshape(1, -1)

    g = gamma.reshape(cout, 1).astype(jnp.float32)
    b = beta.reshape(cout, 1).astype(jnp.float32)
    out = _conv_bn_general(phase_flats, taps, phase_has_b, w_taps, mask,
                           m_valid, g, b, relu=relu, residual=None,
                           out_dtype=out_dtype, tm=tm, n_tiles=n_tiles)
    out = out[:, :m_grid].reshape(cout, n, hs, ws)[:, :, :ho, :wo]
    return out


# --------------------------------------------------------------------------- #
# Bottleneck module: params + forward
# --------------------------------------------------------------------------- #
def init_bottleneck_params(key, inplanes, planes, stride=1, base_width=64,
                           groups=1):
    """Bottleneck(expansion=4).  Prepared (tap, Cout, Cin) bf16 weights are built
    once here so the forward path does no per-call weight reshuffling."""
    width = int(planes * (base_width / 64.0)) * groups
    out_planes = planes * 4
    keys = jax.random.split(key, 4)

    def conv_w(k, shape):
        fan_out = shape[0] * shape[2] * shape[3]
        return jax.random.normal(k, shape, jnp.float32) * math.sqrt(2.0 / fan_out)

    p = {
        "stride": stride,
        "conv1_w": conv_w(keys[0], (width, inplanes, 1, 1)),
        "bn1_g": jnp.ones((width,), jnp.float32),
        "bn1_b": jnp.zeros((width,), jnp.float32),
        "conv2_w": conv_w(keys[1], (width, width, 3, 3)),
        "bn2_g": jnp.ones((width,), jnp.float32),
        "bn2_b": jnp.zeros((width,), jnp.float32),
        "conv3_w": conv_w(keys[2], (out_planes, width, 1, 1)),
        "bn3_g": jnp.ones((out_planes,), jnp.float32),
        "bn3_b": jnp.zeros((out_planes,), jnp.float32),
    }
    if stride != 1 or inplanes != out_planes:
        p["down_w"] = conv_w(keys[3], (out_planes, inplanes, 1, 1))
        p["down_g"] = jnp.ones((out_planes,), jnp.float32)
        p["down_b"] = jnp.zeros((out_planes,), jnp.float32)
    else:
        p["down_w"] = None

    p["conv1_wk"] = _prep_w(p["conv1_w"])
    p["conv2_wk"] = _prep_w(p["conv2_w"])
    p["conv3_wk"] = _prep_w(p["conv3_w"])
    p["down_wk"] = _prep_w(p["down_w"]) if p["down_w"] is not None else None
    return p


def bottleneck_forward(x_nchw, params):
    """conv1x1-bn-relu -> conv3x3(stride)-bn-relu -> conv1x1-bn ->
    (+identity / downsample(x)) -> relu.  NCHW in / NCHW out."""
    # single up-front bf16 cast; activations live in channel-major (C, N, H, W)
    x_cm = jnp.transpose(x_nchw, (1, 0, 2, 3)).astype(jnp.bfloat16)
    stride = params["stride"]

    out = _conv1x1_bn(x_cm, params["conv1_wk"], params["bn1_g"], params["bn1_b"],
                      stride=1, relu=True, out_dtype=jnp.bfloat16)
    out = _conv3x3_bn(out, params["conv2_wk"], params["bn2_g"], params["bn2_b"],
                      stride=stride, relu=True, out_dtype=jnp.bfloat16)

    if params["down_wk"] is not None:
        identity = _conv1x1_bn(x_cm, params["down_wk"], params["down_g"],
                               params["down_b"], stride=stride, relu=False,
                               out_dtype=jnp.bfloat16)
    else:
        identity = x_cm

    out = _conv1x1_bn(out, params["conv3_wk"], params["bn3_g"], params["bn3_b"],
                      stride=1, relu=True, residual=identity,
                      out_dtype=jnp.float32)
    return jnp.transpose(out, (1, 0, 2, 3)).astype(x_nchw.dtype)


# --------------------------------------------------------------------------- #
# pure-JAX reference (operand/storage precision matched to the kernel path)
# --------------------------------------------------------------------------- #
def _ref_bottleneck_forward(x, p):
    def q(a):  # round through bf16, like the kernel's operands / stored tensors
        return a.astype(jnp.bfloat16).astype(jnp.float32)

    def conv(x, w, stride, pad):
        return lax.conv_general_dilated(
            q(x), q(w), window_strides=(stride, stride),
            padding=((pad, pad), (pad, pad)),
            dimension_numbers=("NCHW", "OIHW", "NCHW"))

    def bn(y, g, b):
        y = q(y)  # kernel stores / rounds Y to bf16 before normalizing
        mean = jnp.mean(y, axis=(0, 2, 3), keepdims=True)
        var = jnp.mean(jnp.square(y - mean), axis=(0, 2, 3), keepdims=True)
        return (y - mean) * lax.rsqrt(var + _BN_EPS) * g.reshape(1, -1, 1, 1) \
            + b.reshape(1, -1, 1, 1)

    x = q(x)
    out = q(jax.nn.relu(bn(conv(x, p["conv1_w"], 1, 0), p["bn1_g"], p["bn1_b"])))
    out = q(jax.nn.relu(bn(conv(out, p["conv2_w"], p["stride"], 1),
                           p["bn2_g"], p["bn2_b"])))
    out = bn(conv(out, p["conv3_w"], 1, 0), p["bn3_g"], p["bn3_b"])
    if p["down_w"] is not None:
        identity = q(bn(conv(x, p["down_w"], p["stride"], 0),
                        p["down_g"], p["down_b"]))
    else:
        identity = x
    return jax.nn.relu(out + identity)


# --------------------------------------------------------------------------- #
if __name__ == "__main__":
    root = jax.random.PRNGKey(0)
    kxa, kpa, kxb, kpb = jax.random.split(root, 4)

    # Config A: stride-2 Bottleneck with conv1x1+BN downsample branch.
    #   conv1 exercises the tiled two-pass path; conv2 the stride-2 implicit
    #   3x3 (parity phases); conv3/downsample the fused single-block path.
    xa = jax.random.normal(kxa, (2, 16, 32, 32), jnp.float32)
    pa = init_bottleneck_params(kpa, inplanes=16, planes=8, stride=2)
    ya = jax.block_until_ready(bottleneck_forward(xa, pa))
    assert ya.shape == (2, 32, 16, 16), ya.shape
    assert bool(jnp.all(jnp.isfinite(ya)))
    ra = _ref_bottleneck_forward(xa, pa)
    assert bool(jnp.allclose(ya, ra, rtol=0.05, atol=0.05)), \
        float(jnp.max(jnp.abs(ya - ra)))

    # Config B: identity shortcut (stride=1, inplanes == planes * expansion);
    #   conv2 exercises the stride-1 implicit 3x3 path.
    xb = jax.random.normal(kxb, (2, 32, 16, 16), jnp.float32)
    pb = init_bottleneck_params(kpb, inplanes=32, planes=8, stride=1)
    yb = jax.block_until_ready(bottleneck_forward(xb, pb))
    assert yb.shape == (2, 32, 16, 16), yb.shape
    assert bool(jnp.all(jnp.isfinite(yb)))
    rb = _ref_bottleneck_forward(xb, pb)
    assert bool(jnp.allclose(yb, rb, rtol=0.05, atol=0.05)), \
        float(jnp.max(jnp.abs(yb - rb)))

    print("KERNEL_OK")
</pallas_src>

<mosaic_0001>
module attributes {stable_mosaic.version = 11 : i64} {
  func.func @kernel(%arg0: i32, %arg1: i32, %arg2: memref<16x1024xbf16, #tpu.memory_space<vmem>>, %arg3: memref<1x8x16xbf16, #tpu.memory_space<vmem>>, %arg4: memref<8x1024xbf16, #tpu.memory_space<vmem>>, %arg5: memref<8x1xf32, #tpu.memory_space<vmem>>, %arg6: memref<8x1xf32, #tpu.memory_space<vmem>>, %arg7: memref<8x128xf32, #tpu.memory_space<vmem>>, %arg8: memref<8x128xf32, #tpu.memory_space<vmem>>, %arg9: memref<8x1xf32, #tpu.memory_space<vmem>>) attributes {dimension_semantics = [#tpu.dimension_semantics<parallel>, #tpu.dimension_semantics<arbitrary>], iteration_bounds = array<i64: 1, 2>, scalar_prefetch = 0 : i64, scratch_operands = 3 : i64, tpu.core_type = #tpu.core_type<tc>, window_params = [{transform_indices = @transform_0, window_bounds = array<i64: 16, 1024>}, {transform_indices = @transform_1, window_bounds = array<i64: 1, 8, 16>}, {transform_indices = @transform_2, window_bounds = array<i64: 8, 1024>}, {transform_indices = @transform_3, window_bounds = array<i64: 8, 1>}, {transform_indices = @transform_4, window_bounds = array<i64: 8, 1>}]} {
    %c0 = arith.constant 0 : index
    %c0_0 = arith.constant 0 : index
    %0 = vector.load %arg2[%c0, %c0_0] : memref<16x1024xbf16, #tpu.memory_space<vmem>>, vector<16x1024xbf16>
    %cst = arith.constant 0.000000e+00 : f32
    %1 = vector.broadcast %cst : f32 to vector<8x1024xf32>
    %c0_1 = arith.constant 0 : index
    %c0_2 = arith.constant 0 : index
    %c0_3 = arith.constant 0 : index
    %2 = vector.load %arg3[%c0_1, %c0_2, %c0_3] : memref<1x8x16xbf16, #tpu.memory_space<vmem>>, vector<1x8x16xbf16>
    %3 = vector.shape_cast %2 : vector<1x8x16xbf16> to vector<8x16xbf16>
    %cst_4 = arith.constant dense<0.000000e+00> : vector<8x1024xf32>
    %4 = tpu.matmul %3, %0, %cst_4 {dimension_numbers = #tpu.dot_dimension_numbers<[1], [0], [0], [1], [0, 0, 1, 1], [], []>} : vector<8x16xbf16>, vector<16x1024xbf16>, vector<8x1024xf32> -> vector<8x1024xf32>
    %5 = arith.addf %1, %4 : vector<8x1024xf32>
    %6 = arith.truncf %5 : vector<8x1024xf32> to vector<8x1024xbf16>
    %c0_5 = arith.constant 0 : index
    %c0_6 = arith.constant 0 : index
    %7 = vector.load %arg4[%c0_5, %c0_6] : memref<8x1024xbf16, #tpu.memory_space<vmem>>, vector<8x1024xbf16>
    tpu.vector_store %arg4[%c0_5, %c0_6], %6 {strides = array<i32>} : memref<8x1024xbf16, #tpu.memory_space<vmem>>, vector<8x1024xbf16>,
    %c0_i32 = arith.constant 0 : i32
    %8 = arith.cmpi eq, %arg1, %c0_i32 : i32
    %9 = arith.extui %8 : i1 to i32
    %c0_i32_7 = arith.constant 0 : i32
    %10 = arith.cmpi ne, %9, %c0_i32_7 : i32
    scf.if %10 {
      %cst_75 = arith.constant dense<0.000000e+00> : vector<8xf32>
      %82 = vector.multi_reduction <add>, %5, %cst_75 [1] : vector<8x1024xf32> to vector<8xf32>
      %83 = vector.shape_cast %82 : vector<8xf32> to vector<8x1xf32>
      %cst_76 = arith.constant 9.765625E-4 : f32
      %84 = vector.broadcast %cst_76 : f32 to vector<8x1xf32>
      %85 = arith.mulf %83, %84 : vector<8x1xf32>
      %c0_77 = arith.constant 0 : index
      %c0_78 = arith.constant 0 : index
      %86 = vector.load %arg9[%c0_77, %c0_78] : memref<8x1xf32, #tpu.memory_space<vmem>>, vector<8x1xf32>
      tpu.vector_store %arg9[%c0_77, %c0_78], %85 {strides = array<i32>} : memref<8x1xf32, #tpu.memory_space<vmem>>, vector<8x1xf32>,
      %cst_79 = arith.constant 0.000000e+00 : f32
      %87 = vector.broadcast %cst_79 : f32 to vector<8x128xf32>
      %c0_80 = arith.constant 0 : index
      %c0_81 = arith.constant 0 : index
      %88 = vector.load %arg7[%c0_80, %c0_81] : memref<8x128xf32, #tpu.memory_space<vmem>>, vector<8x128xf32>
      tpu.vector_store %arg7[%c0_80, %c0_81], %87 {strides = array<i32>} : memref<8x128xf32, #tpu.memory_space<vmem>>, vector<8x128xf32>,
      %cst_82 = arith.constant 0.000000e+00 : f32
      %89 = vector.broadcast %cst_82 : f32 to vector<8x128xf32>
      %c0_83 = arith.constant 0 : index
      %c0_84 = arith.constant 0 : index
      %90 = vector.load %arg8[%c0_83, %c0_84] : memref<8x128xf32, #tpu.memory_space<vmem>>, vector<8x128xf32>
      tpu.vector_store %arg8[%c0_83, %c0_84], %89 {strides = array<i32>} : memref<8x128xf32, #tpu.memory_space<vmem>>, vector<8x128xf32>,
    } else {
    }
    %c0_8 = arith.constant 0 : index
    %c0_9 = arith.constant 0 : index
    %11 = vector.load %arg9[%c0_8, %c0_9] : memref<8x1xf32, #tpu.memory_space<vmem>>, vector<8x1xf32>
    %12 = vector.broadcast %11 : vector<8x1xf32> to vector<8x1024xf32>
    %13 = arith.subf %5, %12 : vector<8x1024xf32>
    %14 = arith.mulf %13, %13 : vector<8x1024xf32>
    %c0_10 = arith.constant 0 : index
    %c0_11 = arith.constant 0 : index
    %15 = vector.load %arg7[%c0_10, %c0_11] : memref<8x128xf32, #tpu.memory_space<vmem>>, vector<8x128xf32>
    %16 = vector.extract_strided_slice %13 {offsets = [0, 0], sizes = [8, 128], strides = [1, 1]} : vector<8x1024xf32> to vector<8x128xf32>
    %17 = arith.addf %15, %16 : vector<8x128xf32>
    %c0_12 = arith.constant 0 : index
    %c0_13 = arith.constant 0 : index
    %18 = vector.load %arg7[%c0_12, %c0_13] : memref<8x128xf32, #tpu.memory_space<vmem>>, vector<8x128xf32>
    tpu.vector_store %arg7[%c0_12, %c0_13], %17 {strides = array<i32>} : memref<8x128xf32, #tpu.memory_space<vmem>>, vector<8x128xf32>,
    %c0_14 = arith.constant 0 : index
    %c0_15 = arith.constant 0 : index
    %19 = vector.load %arg8[%c0_14, %c0_15] : memref<8x128xf32, #tpu.memory_space<vmem>>, vector<8x128xf32>
    %20 = vector.extract_strided_slice %14 {offsets = [0, 0], sizes = [8, 128], strides = [1, 1]} : vector<8x1024xf32> to vector<8x128xf32>
    %21 = arith.addf %19, %20 : vector<8x128xf32>
    %c0_16 = arith.constant 0 : index
    %c0_17 = arith.constant 0 : index
    %22 = vector.load %arg8[%c0_16, %c0_17] : memref<8x128xf32, #tpu.memory_space<vmem>>, vector<8x128xf32>
    tpu.vector_store %arg8[%c0_16, %c0_17], %21 {strides = array<i32>} : memref<8x128xf32, #tpu.memory_space<vmem>>, vector<8x128xf32>,
    %c0_18 = arith.constant 0 : index
    %c0_19 = arith.constant 0 : index
    %23 = vector.load %arg7[%c0_18, %c0_19] : memref<8x128xf32, #tpu.memory_space<vmem>>, vector<8x128xf32>
    %24 = vector.extract_strided_slice %13 {offsets = [0, 128], sizes = [8, 128], strides = [1, 1]} : vector<8x1024xf32> to vector<8x128xf32>
    %25 = arith.addf %23, %24 : vector<8x128xf32>
    %c0_20 = arith.constant 0 : index
    %c0_21 = arith.constant 0 : index
    %26 = vector.load %arg7[%c0_20, %c0_21] : memref<8x128xf32, #tpu.memory_space<vmem>>, vector<8x128xf32>
    tpu.vector_store %arg7[%c0_20, %c0_21], %25 {strides = array<i32>} : memref<8x128xf32, #tpu.memory_space<vmem>>, vector<8x128xf32>,
    %c0_22 = arith.constant 0 : index
    %c0_23 = arith.constant 0 : index
    %27 = vector.load %arg8[%c0_22, %c0_23] : memref<8x128xf32, #tpu.memory_space<vmem>>, vector<8x128xf32>
    %28 = vector.extract_strided_slice %14 {offsets = [0, 128], sizes = [8, 128], strides = [1, 1]} : vector<8x1024xf32> to vector<8x128xf32>
    %29 = arith.addf %27, %28 : vector<8x128xf32>
    %c0_24 = arith.constant 0 : index
    %c0_25 = arith.constant 0 : index
    %30 = vector.load %arg8[%c0_24, %c0_25] : memref<8x128xf32, #tpu.memory_space<vmem>>, vector<8x128xf32>
    tpu.vector_store %arg8[%c0_24, %c0_25], %29 {strides = array<i32>} : memref<8x128xf32, #tpu.memory_space<vmem>>, vector<8x128xf32>,
    %c0_26 = arith.constant 0 : index
    %c0_27 = arith.constant 0 : index
    %31 = vector.load %arg7[%c0_26, %c0_27] : memref<8x128xf32, #tpu.memory_space<vmem>>, vector<8x128xf32>
    %32 = vector.extract_strided_slice %13 {offsets = [0, 256], sizes = [8, 128], strides = [1, 1]} : vector<8x1024xf32> to vector<8x128xf32>
    %33 = arith.addf %31, %32 : vector<8x128xf32>
    %c0_28 = arith.constant 0 : index
    %c0_29 = arith.constant 0 : index
    %34 = vector.load %arg7[%c0_28, %c0_29] : memref<8x128xf32, #tpu.memory_space<vmem>>, vector<8x128xf32>
    tpu.vector_store %arg7[%c0_28, %c0_29], %33 {strides = array<i32>} : memref<8x128xf32, #tpu.memory_space<vmem>>, vector<8x128xf32>,
    %c0_30 = arith.constant 0 : index
    %c0_31 = arith.constant 0 : index
    %35 = vector.load %arg8[%c0_30, %c0_31] : memref<8x128xf32, #tpu.memory_space<vmem>>, vector<8x128xf32>
    %36 = vector.extract_strided_slice %14 {offsets = [0, 256], sizes = [8, 128], strides = [1, 1]} : vector<8x1024xf32> to vector<8x128xf32>
    %37 = arith.addf %35, %36 : vector<8x128xf32>
    %c0_32 = arith.constant 0 : index
    %c0_33 = arith.constant 0 : index
    %38 = vector.load %arg8[%c0_32, %c0_33] : memref<8x128xf32, #tpu.memory_space<vmem>>, vector<8x128xf32>
    tpu.vector_store %arg8[%c0_32, %c0_33], %37 {strides = array<i32>} : memref<8x128xf32, #tpu.memory_space<vmem>>, vector<8x128xf32>,
    %c0_34 = arith.constant 0 : index
    %c0_35 = arith.constant 0 : index
    %39 = vector.load %arg7[%c0_34, %c0_35] : memref<8x128xf32, #tpu.memory_space<vmem>>, vector<8x128xf32>
    %40 = vector.extract_strided_slice %13 {offsets = [0, 384], sizes = [8, 128], strides = [1, 1]} : vector<8x1024xf32> to vector<8x128xf32>
    %41 = arith.addf %39, %40 : vector<8x128xf32>
    %c0_36 = arith.constant 0 : index
    %c0_37 = arith.constant 0 : index
    %42 = vector.load %arg7[%c0_36, %c0_37] : memref<8x128xf32, #tpu.memory_space<vmem>>, vector<8x128xf32>
    tpu.vector_store %arg7[%c0_36, %c0_37], %41 {strides = array<i32>} : memref<8x128xf32, #tpu.memory_space<vmem>>, vector<8x128xf32>,
    %c0_38 = arith.constant 0 : index
    %c0_39 = arith.constant 0 : index
    %43 = vector.load %arg8[%c0_38, %c0_39] : memref<8x128xf32, #tpu.memory_space<vmem>>, vector<8x128xf32>
    %44 = vector.extract_strided_slice %14 {offsets = [0, 384], sizes = [8, 128], strides = [1, 1]} : vector<8x1024xf32> to vector<8x128xf32>
    %45 = arith.addf %43, %44 : vector<8x128xf32>
    %c0_40 = arith.constant 0 : index
    %c0_41 = arith.constant 0 : index
    %46 = vector.load %arg8[%c0_40, %c0_41] : memref<8x128xf32, #tpu.memory_space<vmem>>, vector<8x128xf32>
    tpu.vector_store %arg8[%c0_40, %c0_41], %45 {strides = array<i32>} : memref<8x128xf32, #tpu.memory_space<vmem>>, vector<8x128xf32>,
    %c0_42 = arith.constant 0 : index
    %c0_43 = arith.constant 0 : index
    %47 = vector.load %arg7[%c0_42, %c0_43] : memref<8x128xf32, #tpu.memory_space<vmem>>, vector<8x128xf32>
    %48 = vector.extract_strided_slice %13 {offsets = [0, 512], sizes = [8, 128], strides = [1, 1]} : vector<8x1024xf32> to vector<8x128xf32>
    %49 = arith.addf %47, %48 : vector<8x128xf32>
    %c0_44 = arith.constant 0 : index
    %c0_45 = arith.constant 0 : index
    %50 = vector.load %arg7[%c0_44, %c0_45] : memref<8x128xf32, #tpu.memory_space<vmem>>, vector<8x128xf32>
    tpu.vector_store %arg7[%c0_44, %c0_45], %49 {strides = array<i32>} : memref<8x128xf32, #tpu.memory_space<vmem>>, vector<8x128xf32>,
    %c0_46 = arith.constant 0 : index
    %c0_47 = arith.constant 0 : index
    %51 = vector.load %arg8[%c0_46, %c0_47] : memref<8x128xf32, #tpu.memory_space<vmem>>, vector<8x128xf32>
    %52 = vector.extract_strided_slice %14 {offsets = [0, 512], sizes = [8, 128], strides = [1, 1]} : vector<8x1024xf32> to vector<8x128xf32>
    %53 = arith.addf %51, %52 : vector<8x128xf32>
    %c0_48 = arith.constant 0 : index
    %c0_49 = arith.constant 0 : index
    %54 = vector.load %arg8[%c0_48, %c0_49] : memref<8x128xf32, #tpu.memory_space<vmem>>, vector<8x128xf32>
    tpu.vector_store %arg8[%c0_48, %c0_49], %53 {strides = array<i32>} : memref<8x128xf32, #tpu.memory_space<vmem>>, vector<8x128xf32>,
    %c0_50 = arith.constant 0 : index
    %c0_51 = arith.constant 0 : index
    %55 = vector.load %arg7[%c0_50, %c0_51] : memref<8x128xf32, #tpu.memory_space<vmem>>, vector<8x128xf32>
    %56 = vector.extract_strided_slice %13 {offsets = [0, 640], sizes = [8, 128], strides = [1, 1]} : vector<8x1024xf32> to vector<8x128xf32>
    %57 = arith.addf %55, %56 : vector<8x128xf32>
    %c0_52 = arith.constant 0 : index
    %c0_53 = arith.constant 0 : index
    %58 = vector.load %arg7[%c0_52, %c0_53] : memref<8x128xf32, #tpu.memory_space<vmem>>, vector<8x128xf32>
    tpu.vector_store %arg7[%c0_52, %c0_53], %57 {strides = array<i32>} : memref<8x128xf32, #tpu.memory_space<vmem>>, vector<8x128xf32>,
    %c0_54 = arith.constant 0 : index
    %c0_55 = arith.constant 0 : index
    %59 = vector.load %arg8[%c0_54, %c0_55] : memref<8x128xf32, #tpu.memory_space<vmem>>, vector<8x128xf32>
    %60 = vector.extract_strided_slice %14 {offsets = [0, 640], sizes = [8, 128], strides = [1, 1]} : vector<8x1024xf32> to vector<8x128xf32>
    %61 = arith.addf %59, %60 : vector<8x128xf32>
    %c0_56 = arith.constant 0 : index
    %c0_57 = arith.constant 0 : index
    %62 = vector.load %arg8[%c0_56, %c0_57] : memref<8x128xf32, #tpu.memory_space<vmem>>, vector<8x128xf32>
    tpu.vector_store %arg8[%c0_56, %c0_57], %61 {strides = array<i32>} : memref<8x128xf32, #tpu.memory_space<vmem>>, vector<8x128xf32>,
    %c0_58 = arith.constant 0 : index
    %c0_59 = arith.constant 0 : index
    %63 = vector.load %arg7[%c0_58, %c0_59] : memref<8x128xf32, #tpu.memory_space<vmem>>, vector<8x128xf32>
    %64 = vector.extract_strided_slice %13 {offsets = [0, 768], sizes = [8, 128], strides = [1, 1]} : vector<8x1024xf32> to vector<8x128xf32>
    %65 = arith.addf %63, %64 : vector<8x128xf32>
    %c0_60 = arith.constant 0 : index
    %c0_61 = arith.constant 0 : index
    %66 = vector.load %arg7[%c0_60, %c0_61] : memref<8x128xf32, #tpu.memory_space<vmem>>, vector<8x128xf32>
    tpu.vector_store %arg7[%c0_60, %c0_61], %65 {strides = array<i32>} : memref<8x128xf32, #tpu.memory_space<vmem>>, vector<8x128xf32>,
    %c0_62 = arith.constant 0 : index
    %c0_63 = arith.constant 0 : index
    %67 = vector.load %arg8[%c0_62, %c0_63] : memref<8x128xf32, #tpu.memory_space<vmem>>, vector<8x128xf32>
    %68 = vector.extract_strided_slice %14 {offsets = [0, 768], sizes = [8, 128], strides = [1, 1]} : vector<8x1024xf32> to vector<8x128xf32>
    %69 = arith.addf %67, %68 : vector<8x128xf32>
    %c0_64 = arith.constant 0 : index
    %c0_65 = arith.constant 0 : index
    %70 = vector.load %arg8[%c0_64, %c0_65] : memref<8x128xf32, #tpu.memory_space<vmem>>, vector<8x128xf32>
    tpu.vector_store %arg8[%c0_64, %c0_65], %69 {strides = array<i32>} : memref<8x128xf32, #tpu.memory_space<vmem>>, vector<8x128xf32>,
    %c0_66 = arith.constant 0 : index
    %c0_67 = arith.constant 0 : index
    %71 = vector.load %arg7[%c0_66, %c0_67] : memref<8x128xf32, #tpu.memory_space<vmem>>, vector<8x128xf32>
    %72 = vector.extract_strided_slice %13 {offsets = [0, 896], sizes = [8, 128], strides = [1, 1]} : vector<8x1024xf32> to vector<8x128xf32>
    %73 = arith.addf %71, %72 : vector<8x128xf32>
    %c0_68 = arith.constant 0 : index
    %c0_69 = arith.constant 0 : index
    %74 = vector.load %arg7[%c0_68, %c0_69] : memref<8x128xf32, #tpu.memory_space<vmem>>, vector<8x128xf32>
    tpu.vector_store %arg7[%c0_68, %c0_69], %73 {strides = array<i32>} : memref<8x128xf32, #tpu.memory_space<vmem>>, vector<8x128xf32>,
    %c0_70 = arith.constant 0 : index
    %c0_71 = arith.constant 0 : index
    %75 = vector.load %arg8[%c0_70, %c0_71] : memref<8x128xf32, #tpu.memory_space<vmem>>, vector<8x128xf32>
    %76 = vector.extract_strided_slice %14 {offsets = [0, 896], sizes = [8, 128], strides = [1, 1]} : vector<8x1024xf32> to vector<8x128xf32>
    %77 = arith.addf %75, %76 : vector<8x128xf32>
    %c0_72 = arith.constant 0 : index
    %c0_73 = arith.constant 0 : index
    %78 = vector.load %arg8[%c0_72, %c0_73] : memref<8x128xf32, #tpu.memory_space<vmem>>, vector<8x128xf32>
    tpu.vector_store %arg8[%c0_72, %c0_73], %77 {strides = array<i32>} : memref<8x128xf32, #tpu.memory_space<vmem>>, vector<8x128xf32>,
    %c1_i32 = arith.constant 1 : i32
    %79 = arith.cmpi eq, %arg1, %c1_i32 : i32
    %80 = arith.extui %79 : i1 to i32
    %c0_i32_74 = arith.constant 0 : i32
    %81 = arith.cmpi ne, %80, %c0_i32_74 : i32
    scf.if %81 {
      %c0_75 = arith.constant 0 : index
      %c0_76 = arith.constant 0 : index
      %82 = vector.load %arg7[%c0_75, %c0_76] : memref<8x128xf32, #tpu.memory_space<vmem>>, vector<8x128xf32>
      %cst_77 = arith.constant dense<0.000000e+00> : vector<8xf32>
      %83 = vector.multi_reduction <add>, %82, %cst_77 [1] : vector<8x128xf32> to vector<8xf32>
      %84 = vector.shape_cast %83 : vector<8xf32> to vector<8x1xf32>
      %cst_78 = arith.constant 4.8828125E-4 : f32
      %85 = vector.broadcast %cst_78 : f32 to vector<8x1xf32>
      %86 = arith.mulf %84, %85 : vector<8x1xf32>
      %c0_79 = arith.constant 0 : index
      %c0_80 = arith.constant 0 : index
      %87 = vector.load %arg8[%c0_79, %c0_80] : memref<8x128xf32, #tpu.memory_space<vmem>>, vector<8x128xf32>
      %cst_81 = arith.constant dense<0.000000e+00> : vector<8xf32>
      %88 = vector.multi_reduction <add>, %87, %cst_81 [1] : vector<8x128xf32> to vector<8xf32>
      %89 = vector.shape_cast %88 : vector<8xf32> to vector<8x1xf32>
      %cst_82 = arith.constant 4.8828125E-4 : f32
      %90 = vector.broadcast %cst_82 : f32 to vector<8x1xf32>
      %91 = arith.mulf %89, %90 : vector<8x1xf32>
      %c0_83 = arith.constant 0 : index
      %c0_84 = arith.constant 0 : index
      %92 = vector.load %arg9[%c0_83, %c0_84] : memref<8x1xf32, #tpu.memory_space<vmem>>, vector<8x1xf32>
      %93 = arith.addf %92, %86 : vector<8x1xf32>
      %c0_85 = arith.constant 0 : index
      %c0_86 = arith.constant 0 : index
      %94 = vector.load %arg5[%c0_85, %c0_86] : memref<8x1xf32, #tpu.memory_space<vmem>>, vector<8x1xf32>
      tpu.vector_store %arg5[%c0_85, %c0_86], %93 {strides = array<i32>} : memref<8x1xf32, #tpu.memory_space<vmem>>, vector<8x1xf32>,
      %95 = arith.mulf %86, %86 : vector<8x1xf32>
      %96 = arith.subf %91, %95 : vector<8x1xf32>
      %c0_87 = arith.constant 0 : index
      %c0_88 = arith.constant 0 : index
      %97 = vector.load %arg6[%c0_87, %c0_88] : memref<8x1xf32, #tpu.memory_space<vmem>>, vector<8x1xf32>
      tpu.vector_store %arg6[%c0_87, %c0_88], %96 {strides = array<i32>} : memref<8x1xf32, #tpu.memory_space<vmem>>, vector<8x1xf32>,
    } else {
    }
    return
  }
  func.func @transform_0(%arg0: i32, %arg1: i32) -> (i32, i32) {
    %c0_i32 = arith.constant 0 : i32
    %c0_i32_0 = arith.constant 0 : i32
    return %c0_i32, %arg1 : i32, i32
  }
  func.func @transform_1(%arg0: i32, %arg1: i32) -> (i32, i32, i32) {
    %c0_i32 = arith.constant 0 : i32
    %c0_i32_0 = arith.constant 0 : i32
    %c0_i32_1 = arith.constant 0 : i32
    return %c0_i32, %arg0, %c0_i32_0 : i32, i32, i32
  }
  func.func @transform_2(%arg0: i32, %arg1: i32) -> (i32, i32) {
    %c0_i32 = arith.constant 0 : i32
    return %arg0, %arg1 : i32, i32
  }
  func.func @transform_3(%arg0: i32, %arg1: i32) -> (i32, i32) {
    %c0_i32 = arith.constant 0 : i32
    %c0_i32_0 = arith.constant 0 : i32
    return %arg0, %c0_i32 : i32, i32
  }
  func.func @transform_4(%arg0: i32, %arg1: i32) -> (i32, i32) {
    %c0_i32 = arith.constant 0 : i32
    %c0_i32_0 = arith.constant 0 : i32
    return %arg0, %c0_i32 : i32, i32
  }
}

</mosaic_0001>

<bundles_post_ra>
// kernel: tpu_custom_call.1
= control target key start
LH: loop header
LB: loop body
LE: loop exit
PB: predicated region body
PF: predicated region fallthrough
CT: control target
= control target key end

     0   :  { %s1279_s0 = inlined_call_operand.hbm [shape: bf16[16,2048], index: 0, kind: input, shape index: {}]   ;;  %s1280_s1 = inlined_call_operand.hbm [shape: bf16[1,8,16], index: 1, kind: input, shape index: {}]   ;;  %s1281_s2 = inlined_call_operand.hbm [shape: bf16[8,2048], index: 2, kind: output, shape index: {0}]   ;;  %s1282_s3 = inlined_call_operand.vmem [shape: f32[8,1], index: 3, kind: output, shape index: {1}]   ;;  %s1283_s4 = inlined_call_operand.vmem [shape: f32[8,1], index: 4, kind: output, shape index: {2}]  }
   0x1   :  { %1287 = sst [smem:[#allocation15_spill]] %s1280_s1 }
   0x2   :  { %10 = vsyncpa [#allocation6], 0 }
   0x3   :  { %12 = vsyncpa [#allocation6 + $0x1], 0 }
   0x4   :  { %13 = vsyncpa [#allocation9], 0 }
   0x5   :  { %14 = vsyncpa [#allocation7], 0 }
   0x6   :  { %16 = vsyncpa [#allocation7 + $0x1], 0  ;;  %s1095_s15 = smov 0   ;;  %s1097_s16 = smov 0  }
   0x7   :  { %s1099_s17 = smov 0   ;;  %s1101_s18 = smov 0  }
   0x8   :  { %s1103_s19 = smov 0   ;;  %s1105_s20 = smov 0  }
   0x9 LB: > { %s800_s21 = sadd.s32 4294967295, %s1060_s20   ;;  %s801_s22 = sadd.s32 4294967294, %s1060_s20   ;;  %s1060_s20 = sphi %s1105_s20, %s22_s20   ;;  %s1056_s19 = sphi %s1103_s19, %s1307_s19   ;;  %s1052_s18 = sphi %s1101_s18, %s1306_s18   ;;  %s1048_s17 = sphi %s1099_s17, %s1305_s17   ;;  %s1044_s16 = sphi %s1097_s16, %s1304_s16   ;;  %s1040_s15 = sphi %s1095_s15, %s1303_s15  }
   0xa   : > { %s41_s23 = sadd.s32 1, %s1048_s17  ;;  %p48_p0 = scmp.ne.s32.totalorder %s1048_s17, %s1044_s16 }
   0xb   : > { %p49_p1 = scmp.eq.s32.totalorder %s1060_s20, 0  ;;  %p54_p2 = scmp.ne.s32.totalorder %s1044_s16, %s1040_s15 }
   0xc   : > { %p1133_p3 = scmp.eq.s32.totalorder %s800_s21, 0  ;;  %p106_p4 = scmp.eq.s32.totalorder %s800_s21, 1 }
   0xd   : > { %p1137_p5 = por %p49_p1, %p48_p0  ;;  %p112_p6 = scmp.eq.s32.totalorder %s801_s22, 1 }
   0xe   : > { %p1143_p7 = por %p1133_p3, %p54_p2  ;;  %p1147_p8 = por %p106_p4, %p48_p0 }
   0xf   : > { %p1151_p9 = por %p112_p6, %p54_p2  ;;  %p802_p10 = scmp.ge.s32.totalorder %s1060_s20, 1 }
  0x10   : > { %s1290_s26 = scalar_select %p1143_p7, 1, 0 }
  0x11   : > { %s1291_s27 = scalar_select %p1147_p8, 1, 0 }
  0x12   : > { %s1292_s28 = scalar_select %p1151_p9, 1, 0 }
  0x13   : > { %p171_p11 = scmp.lt.s32.totalorder %s1060_s20, 3  ;;  %s1062_s30 = smov [#allocation8]  }
  0x14   : > { %s186_s5 = sshll.u32 %s1062_s30, 4  ;;  %p864_p1 = scmp.lt.s32.totalorder %s1060_s20, 2  ;;  %s187_s5 = int_to_ptr.vmem [resolvable:$true] %s186_s5 }
  0x15   : > { %p1158_p13 = pnand %p802_p10, %p171_p11  ;;  %s31_s8 = sadd.s32 1, %s1056_s19 }
  0x16   : > { %p1167_p4 = pnand %p864_p1, %p1137_p5  ;;  %p32_p6 = scmp.ge.s32.totalorder %s31_s8, 2 }
  0x17   : > { %p851_p0 = pneg %p1158_p13  ;;  %s197_s9 = sand.u32 1, %s1048_s17  }
  0x18   : > { %s933_s10 = scalar_lea.vmem %s187_s5, 64  ;;  %p941_p8 = scmp.lt.s32.totalorder %s187_s5, %s187_s5 }
  0x19   : > { %p1173_p2 = pnand %p851_p0, %p1133_p3  ;;  %p934_p11 = scmp.ne.s32.totalorder %s187_s5, %s933_s10 }
  0x1a   : > { %p942_p5 = scmp.lt.s32.totalorder %s933_s10, %s933_s10 }
  0x1b   : > { %p924_p10 = pneg %p1173_p2 }
  0x1c   : > { %p943_p1 = por %p942_p5, %p941_p8 }
  0x1d   : > { %p936_p12 = pnand %p934_p11, %p924_p10 }
  0x1f   : > { %p937_p9 = pneg %p936_p12 }
  0x21   : > { %p944_p7 = pnand %p943_p1, %p937_p9 }
  0x23   : > { %947 = shalt.err (!%p944_p7)
}
  0x24   : > { %s1296_s1 = sld [smem:[#allocation15_spill]]  ;;  %s1309_s8 = smov (%p32_p6, %s31_s8), 0 }
  0x25   : > { %1297 = sst [smem:[#allocation14_spill]] %s1309_s8  ;;  %s805_s13 = sshll.u32 %s197_s9, 6 }
  0x26   : > { %s38_s14 = ssub.s32 %s1056_s19, %s1309_s8  ;;  %s837_s21 = sshll.u32 %s1056_s19, 9 }
  0x27   : > { %p39_p12 = scmp.eq.s32.totalorder %s38_s14, 0  ;;  %s207_s30 = scalar_lea.hbm %s1279_s0, %s837_s21 }
  0x28   : > { %s201_s7 = scalar_lea.vmem [#allocation5], %s805_s13  ;;  %s198_s12 = scalar_lea.sflag [#allocation6], %s197_s9 }
  0x29   : > { %s208_s10 = sshll.u32 %s201_s7, 4  ;;  %p950_p7 = pneg %p1167_p4  ;;  %s209_s10 = int_to_ptr.vmem [resolvable:$true] %s208_s10 }
  0x2a   : > { %854 = dma.hbm_to_vmem [thread:$0]  (!%p1173_p2), %s1296_s1, 64, %s187_s5, [#allocation9]  }
  0x2b   : > { %s1197_s11 = scalar_select %p39_p12, %s1048_s17, %s41_s23  }
  0x2c   : > { %s961_s5 = scalar_lea.vmem %s209_s10, 1024  ;;  %s1063_s1 = smov [#allocation5]  }
  0x2d   : > { %p962_p8 = scmp.ne.s32.totalorder %s209_s10, %s961_s5  ;;  %s966_s14 = sshll.u32 %s1063_s1, 4  ;;  %s967_s14 = int_to_ptr.vmem [resolvable:$false] %s966_s14 }
  0x2e   : > { %s968_s8 = scalar_lea.vmem %s967_s14, 2048  ;;  %p969_p2 = scmp.lt.s32.totalorder %s209_s10, %s967_s14 }
  0x2f   : > { %p964_p9 = pnand %p962_p8, %p950_p7  ;;  %p970_p6 = scmp.lt.s32.totalorder %s968_s8, %s961_s5 }
  0x31   : > { %p965_p0 = pneg %p964_p9  ;;  %p971_p10 = por %p970_p6, %p969_p2 }
  0x33   : > { %p972_p11 = pnand %p971_p10, %p965_p0 }
  0x35   : > { %975 = shalt.err (!%p972_p11)
}
  0x36   : > { %s1064_s13 = smov 1024   ;;  %s1065_s23 = smov 512  }
  0x37   : > { %s1066_s21 = smov 32   ;;  %220 = sbr.rel (%p1158_p13) target bundleno = 761 (0x2f9), region = 28 }
  0x38   : > { %858 = dma.hbm_to_vmem [thread:$0]  (!%p1167_p4), %s207_s30, 1024, %s209_s10, %s198_s12, %s1064_s13, %s1065_s23, %s1066_s21  }
  0x39   : > { %s1206_s9 = sand.u32 (!%p1158_p13), 1, %s1044_s16   ;;  %p1298_p5 = scmp.ne.s32.totalorder (!%p1158_p13), %s1290_s26, 0 }
  0x3a   : > { %s809_s1 = sshll.u32 (!%p1158_p13), %s1206_s9, 6  ;;  %s223_s8 = scalar_lea.sflag (!%p1158_p13), [#allocation6], %s1206_s9 }
  0x3b   : > { %s226_s22 = scalar_lea.vmem (!%p1158_p13), [#allocation5], %s809_s1 }
  0x3c   : > { %1027 = dma.done.wait (%p1298_p5), %s223_s8, 1024  }
  0x3d   : > { %1029 = vsyncadd (%p1298_p5), %s223_s8, 4294966272 }
  0x3e   : > { %1031 = dma.done.wait (%p1133_p3), [#allocation9], 64  }
  0x3f   : > { %1033 = vsyncadd (%p1133_p3), [#allocation9], 4294967232  ;;  %v1067_v0 = vmov 0   ;;  %v274_v1 = vld [vmem:[%s226_s22] sm:$0xff]  ;;  %v275_v3 = vld [vmem:[%s226_s22 + $0x8] sm:$0xff]  ;;  %vm323_vm0 = vcmask 130048  }
  0x40   : > { %359 = vmatprep.mubr.bf16.mxu0 %v1067_v0  ;;  %400 = vmatprep.mubr.bf16.mxu1 %v1067_v0  ;;  %v278_v2 = vld [vmem:[%s226_s22 + $0x20] sm:$0xff]  ;;  %v279_v5 = vld [vmem:[%s226_s22 + $0x28] sm:$0xff]  ;;  %v276_v7 = vld [vmem:[%s226_s22 + $0x10] sm:$0xff]  ;;  %s811_s24 = sshll.u32 %s1206_s9, 5  ;;  %p828_p3 = scmp.ne.s32.totalorder %s1052_s18, 0 }
  0x41   : > { %v813_v4 = vcombine.high %v274_v1, %v278_v2  ;;  %v812_v6 = vcombine.low %v274_v1, %v278_v2  ;;  %v815_v8 = vcombine.high %v275_v3, %v279_v5  ;;  %v814_v9 = vcombine.low %v275_v3, %v279_v5  ;;  %v280_v10 = vld [vmem:[%s226_s22 + $0x30] sm:$0xff]  ;;  %v277_v11 = vld [vmem:[%s226_s22 + $0x18] sm:$0xff]  ;;  %v282_v15 = vld [vmem:[#allocation8] sm:$0xf]  ;;  %s1223_s26 = scalar_lea.vmem [#allocation10], %s811_s24 }
  0x42   : > { %v281_v12 = vld [vmem:[%s226_s22 + $0x38] sm:$0xff]  ;;  %v817_v13 = vcombine.high %v276_v7, %v280_v10  ;;  %v816_v16 = vcombine.low %v276_v7, %v280_v10 }
  0x43   : > { %341 = vmatprep.subr.bf16.mxu0 %v813_v4  ;;  %v819_v14 = vcombine.high %v277_v11, %v281_v12  ;;  %382 = vmatprep.subr.bf16.mxu1 %v815_v8  ;;  %v818_v17 = vcombine.low %v277_v11, %v281_v12 }
  0x44   : > { %342 = vmatpush1.bf16.msra.mxu0 %v812_v6  ;;  %383 = vmatpush1.bf16.msra.mxu1 %v814_v9 }
  0x45   : > { %423 = vmatprep.subr.bf16.mxu0 %v817_v13  ;;  %464 = vmatprep.subr.bf16.mxu1 %v819_v14 }
  0x47   : > { %820 = vmatmul.mubr.msk.bf16.vlgmr.msra.gmra.mxu0 %vm323_vm0, %v282_v15  ;;  %821 = vmatmul.mubr.msk.bf16.vlgmr.msra.gmra.mxu1 %vm323_vm0, %v282_v15 }
  0x48   : > { %424 = vmatpush1.bf16.msra.mxu0 %v816_v16  ;;  %465 = vmatpush1.bf16.msra.mxu1 %v818_v17 }
  0x49   : > { %441 = vmatprep.mubr.bf16.mxu0 %v1067_v0  ;;  %482 = vmatprep.mubr.bf16.mxu1 %v1067_v0 }
  0x4f   : > { %822 = vmatmul.mubr.msk.bf16.vlgmr.msra.gmra.mxu0 %vm323_vm0, %v282_v15  ;;  %823 = vmatmul.mubr.msk.bf16.vlgmr.msra.gmra.mxu1 %vm323_vm0, %v282_v15 }
 0x107   : > { %v361_v18 = vpop.f32.mrf.mxu0  ;;  %v402_v19 = vpop.f32.mrf.mxu1 }
 0x109   : > { %v363_v20 = vpop.f32.mrf.mxu0  ;;  %v404_v22 = vpop.f32.mrf.mxu1 }
 0x10a   : > { %v838_v21 = vpack.c.bf16 %v363_v20, %v361_v18  ;;  %v839_v23 = vpack.c.bf16 %v404_v22, %v402_v19 }
 0x10b   : > { %v365_v24 = vpop.f32.mrf.mxu0  ;;  %v406_v25 = vpop.f32.mrf.mxu1 }
 0x10c   : > { %523 = vst [vmem:[%s1223_s26] sm:$0xff] %v838_v21  ;;  %524 = vst [vmem:[%s1223_s26 + $0x8] sm:$0xff] %v839_v23 }
 0x10d   : > { %v366_v26 = vpop.f32.mrf.mxu0  ;;  %v407_v27 = vpop.f32.mrf.mxu1 }
 0x10f   : > { %v443_v28 = vpop.f32.mrf.mxu0  ;;  %v484_v29 = vpop.f32.mrf.mxu1 }
 0x111   : > { %v445_v30 = vpop.f32.mrf.mxu0  ;;  %v486_v32 = vpop.f32.mrf.mxu1  ;;  %530 = sbr.rel (%p828_p3) target bundleno = 433 (0x1b1), region = 40 }
 0x112   : > { %v840_v31 = vpack.c.bf16 %v445_v30, %v443_v28  ;;  %v841_v33 = vpack.c.bf16 %v486_v32, %v484_v29 }
 0x113   : > { %v447_v34 = vpop.f32.mrf.mxu0  ;;  %v488_v35 = vpop.f32.mrf.mxu1 }
 0x114   : > { %525 = vst [vmem:[%s1223_s26 + $0x10] sm:$0xff] %v840_v31  ;;  %526 = vst [vmem:[%s1223_s26 + $0x18] sm:$0xff] %v841_v33 }
 0x115   : > { %v448_v36 = vpop.f32.mrf.mxu0  ;;  %v489_v37 = vpop.f32.mrf.mxu1 }
 0x116   : > { %v531_v38 = vadd.f32 %v363_v20, %v361_v18  ;;  %v1068_v45 = vmov 0.0   ;;  %vm541_vm1 = vcmask 7168  }
 0x117   : > { %543 = vst [vmem:[#allocation2] sm:$0xff] %v1068_v45  ;;  %544 = vst [vmem:[#allocation3] sm:$0xff] %v1068_v45 }
 0x118   : > { %v532_v39 = vadd.f32 %v531_v38, %v402_v19 }
 0x11a   : > { %v533_v40 = vadd.f32 %v532_v39, %v404_v22 }
 0x11c   : > { %v534_v41 = vadd.f32 %v533_v40, %v443_v28 }
 0x11e   : > { %v535_v42 = vadd.f32 %v534_v41, %v445_v30 }
 0x120   : > { %v536_v43 = vadd.f32 %v535_v42, %v484_v29 }
 0x122   : > { %v537_v44 = vadd.f32 %v536_v43, %v486_v32 }
 0x124   : > { %538 = vadd.xlane.f32.xlu0 %v537_v44 }
 0x1ad   : > { %v539_v46 = vpop.xlane.xlu0 %538 }
 0x1ae   : > { %v540_v47 = vmul.f32 0.0009765625, %v539_v46 }
 0x1b0   : > { %542 = vst.msk [vmem:[#allocation4] sm:$0xff] %vm541_vm1, %v540_v47 }
 0x1b1 PF: > { %921 = vset.pattern.permute.xlu0 %v1067_v0  ;;  %v567_v52 = vld [vmem:[#allocation2] sm:$0xff]  ;;  %v570_v53 = vld [vmem:[#allocation3] sm:$0xff]  ;;  %p829_p13 = scmp.ne.s32.totalorder %s1052_s18, 1 }
 0x1b7   : > { %v545_v48 = vld [vmem:[#allocation4] sm:$0xff] }
 0x1b8   : > { %548 = vperm.xlu0 %921, %v545_v48  }
 0x233   : > { %v549_v49 = vpop.permute.xlu0 %548 }
 0x234   : > { %v551_v50 = vsub.f32 %v361_v18, %v549_v49  ;;  %v552_v51 = vsub.f32 %v363_v20, %v549_v49  ;;  %v553_v54 = vsub.f32 %v402_v19, %v549_v49  ;;  %v554_v56 = vsub.f32 %v404_v22, %v549_v49 }
 0x235   : > { %v555_v60 = vsub.f32 %v443_v28, %v549_v49  ;;  %v556_v1 = vsub.f32 %v445_v30, %v549_v49  ;;  %v557_v4 = vsub.f32 %v484_v29, %v549_v49  ;;  %v558_v8 = vsub.f32 %v486_v32, %v549_v49 }
 0x236   : > { %v559_v55 = vmul.f32 %v551_v50, %v551_v50  ;;  %v560_v57 = vmul.f32 %v552_v51, %v552_v51  ;;  %v568_v58 = vadd.f32 %v567_v52, %v551_v50  ;;  %v561_v61 = vmul.f32 %v553_v54, %v553_v54 }
 0x237   : > { %v562_v2 = vmul.f32 %v554_v56, %v554_v56  ;;  %v563_v5 = vmul.f32 %v555_v60, %v555_v60  ;;  %v564_v9 = vmul.f32 %v556_v1, %v556_v1  ;;  %v565_v12 = vmul.f32 %v557_v4, %v557_v4 }
 0x238   : > { %v571_v59 = vadd.f32 %v570_v53, %v559_v55  ;;  %v574_v62 = vadd.f32 %v568_v58, %v552_v51  ;;  %v566_v15 = vmul.f32 %v558_v8, %v558_v8 }
 0x23a   : > { %v577_v63 = vadd.f32 %v571_v59, %v560_v57  ;;  %v580_v0 = vadd.f32 %v574_v62, %v553_v54 }
 0x23c   : > { %v583_v3 = vadd.f32 %v577_v63, %v561_v61  ;;  %v586_v6 = vadd.f32 %v580_v0, %v554_v56 }
 0x23e   : > { %v589_v7 = vadd.f32 %v583_v3, %v562_v2  ;;  %v592_v10 = vadd.f32 %v586_v6, %v555_v60 }
 0x240   : > { %v595_v11 = vadd.f32 %v589_v7, %v563_v5  ;;  %v598_v13 = vadd.f32 %v592_v10, %v556_v1 }
 0x242   : > { %v601_v14 = vadd.f32 %v595_v11, %v564_v9  ;;  %v604_v16 = vadd.f32 %v598_v13, %v557_v4 }
 0x244   : > { %v607_v17 = vadd.f32 %v601_v14, %v565_v12  ;;  %v610_v18 = vadd.f32 %v604_v16, %v558_v8  ;;  %618 = sbr.rel (%p829_p13) target bundleno = 737 (0x2e1), region = 44 }
 0x246   : > { %v613_v19 = vadd.f32 %v607_v17, %v566_v15  ;;  %611 = vst [vmem:[#allocation2] sm:$0xff] %v610_v18 }
 0x248   : > { %614 = vst [vmem:[#allocation3] sm:$0xff] %v613_v19 }
 0x249   : > { %v627_v22 = vld [vmem:[#allocation4] sm:$0xff]  ;;  %vm629_vm2 = vcmask 7168  }
 0x24d   : > { %v619_v20 = vld [vmem:[#allocation2] sm:$0xff] }
 0x24e   : > { %620 = vadd.xlane.f32.xlu0 %v619_v20 }
 0x24f   : > { %v623_v21 = vld [vmem:[#allocation3] sm:$0xff] }
 0x252   : > { %624 = vadd.xlane.f32.xlu0 %v623_v21 }
 0x2d7   : > { %v621_v23 = vpop.xlane.xlu0 %620 }
 0x2d8   : > { %v622_v24 = vmul.f32 0.00048828125, %v621_v23 }
 0x2da   : > { %v628_v25 = vadd.f32 %v627_v22, %v622_v24  ;;  %v631_v27 = vmul.f32 %v622_v24, %v622_v24 }
 0x2db   : > { %v625_v26 = vpop.xlane.xlu0 %624 }
 0x2dc   : > { %630 = vst.msk [vmem:[%s1282_s3] sm:$0xff] %vm629_vm2, %v628_v25  ;;  %v626_v28 = vmul.f32 0.00048828125, %v625_v26 }
 0x2de   : > { %v632_v29 = vsub.f32 %v626_v28, %v631_v27 }
 0x2e0   : > { %633 = vst.msk [vmem:[%s1283_s4] sm:$0xff] %vm629_vm2, %v632_v29 }
 0x2e1 PF: > { %s842_s7 = sshll.u32 %s1052_s18, 9  ;;  %s659_s14 = sshll.u32 %s1223_s26, 4  ;;  %s660_s14 = int_to_ptr.vmem [resolvable:$true] %s659_s14 }
 0x2e2   : > { %s657_s5 = scalar_lea.hbm %s1281_s2, %s842_s7  ;;  %s635_s13 = scalar_lea.sflag [#allocation7], %s1206_s9 }
 0x2e3   : > { %s976_s23 = scalar_lea.vmem %s660_s14, 512  ;;  %p1299_p1 = scmp.ne.s32.totalorder %s1291_s27, 0 }
 0x2e4   : > { %p977_p4 = scmp.ne.s32.totalorder %s660_s14, %s976_s23  ;;  %s1069_s21 = smov [#allocation10]  }
 0x2e5   : > { %s980_s1 = sshll.u32 %s1069_s21, 4  ;;  %s981_s1 = int_to_ptr.vmem [resolvable:$false] %s980_s1 }
 0x2e6   : > { %p978_p12 = pnand %p977_p4, %p1299_p1  ;;  %s982_s8 = scalar_lea.vmem %s981_s1, 1024 }
 0x2e7   : > { %p983_p8 = scmp.lt.s32.totalorder %s660_s14, %s981_s1  ;;  %p984_p9 = scmp.lt.s32.totalorder %s982_s8, %s976_s23 }
 0x2e8   : > { %p979_p7 = pneg %p978_p12 }
 0x2e9   : > { %p985_p0 = por %p984_p9, %p983_p8 }
 0x2eb   : > { %p986_p2 = pnand %p985_p0, %p979_p7 }
 0x2ed   : > { %989 = shalt.err (!%p986_p2)
}
 0x2ee   : > { %s990_s18 = scalar_lea.hbm %s657_s5, 512  ;;  %s994_s24 = scalar_lea.hbm %s1281_s2, 1024 }
 0x2ef   : > { %p991_p6 = scmp.ne.s32.totalorder %s657_s5, %s990_s18  ;;  %p995_p5 = scmp.lt.s32.totalorder %s657_s5, %s1281_s2 }
 0x2f0   : > { %p996_p3 = scmp.lt.s32.totalorder %s994_s24, %s990_s18 }
 0x2f1   : > { %p992_p10 = pnand %p991_p6, %p1299_p1 }
 0x2f2   : > { %p997_p13 = por %p996_p3, %p995_p5 }
 0x2f3   : > { %p993_p11 = pneg %p992_p10 }
 0x2f5   : > { %p998_p4 = pnand %p997_p13, %p993_p11 }
 0x2f7   : > { %1001 = shalt.err (!%p998_p4)
}
 0x2f8   : > { %849 = dma.vmem_to_hbm [thread:$0]  (%p1299_p1), %s660_s14, 512, %s657_s5, %s635_s13  }
 0x2f9 PF: > { %s691_s6 = sand.u32 1, %s1040_s15   ;;  %p1300_p12 = scmp.ne.s32.totalorder %s1292_s28, 0 }
 0x2fa   : > { %p1301_p7 = scmp.ge.s32.totalorder %s1060_s20, 2  ;;  %s692_s25 = scalar_lea.sflag [#allocation7], %s691_s6 }
 0x2fc   : > { %p860_p8 = pnand %p1301_p7, %p1300_p12 }
 0x2fe   : > { %p861_p9 = pneg %p860_p8 }
 0x300   : > { %1035 = dma.done.wait (%p861_p9), %s692_s25, 512  }
 0x301   : > { %1037 = vsyncadd (%p861_p9), %s692_s25, 4294966784  ;;  %s22_s20 = sadd.s32 1, %s1060_s20   ;;  %s1302_s27 = sld [smem:[#allocation14_spill]] }
 0x302   : > { %p19_p0 = scmp.ge.s32.totalorder %s22_s20, 4   ;;  %s1303_s15 = smov %s1044_s16 }
 0x303   : > { %s1304_s16 = smov %s1048_s17  ;;  %s1305_s17 = smov %s1197_s11 }
 0x304   : > { %s1306_s18 = smov %s1056_s19  ;;  %21 = sbr.rel (!%p19_p0) target bundleno = 9 (0x9), region = 110 }
 0x307   : > { %s1307_s19 = smov %s1302_s27 }
 0x309   :  { %697 = vsyncpa [#allocation6], 1 }
 0x30a   :  { %699 = vsyncpa [#allocation6 + $0x1], 1 }
 0x30b   :  { %700 = vsyncpa [#allocation9], 1 }
 0x30c   :  { %701 = vsyncpa [#allocation7], 1 }
 0x30d   :  { %703 = vsyncpa [#allocation7 + $0x1], 1 }

</bundles_post_ra>
